<compile_context>
chip_gen: v6e
topology: v6e:2x2x1
jax: 0.10.0
libtpu: 0.0.40
codegen_flags: <defaults>
</compile_context>

<pallas_src>
import functools

import jax
import jax.numpy as jnp
import numpy as np
from jax.experimental import pallas as pl
from jax.experimental.pallas import tpu as pltpu


def _channel_gate_kernel(x_ref, w1_ref, b1_ref, w2_ref, b2_ref, out_ref,
                         acc_ref, *, inv_hw):
    """Grid = (B, n_hw).  x_ref: (1, C, HW_TILE); out_ref: (1, 1, C)."""
    hw = pl.program_id(1)

    @pl.when(hw == 0)
    def _init():
        acc_ref[...] = jnp.zeros_like(acc_ref)

    # Per-tile partial sum over the spatial (lane) axis -> (1, C).
    acc_ref[...] += jnp.sum(x_ref[...], axis=-1)

    @pl.when(hw == pl.num_programs(1) - 1)
    def _finalize():
        pooled = acc_ref[...] * inv_hw                    # (1, C) == avg_pool2d
        # mlp: Linear(C, C//r) -> ReLU -> Linear(C//r, C).  Tiny vs. the
        # O(B*C*HW) HBM traffic, so no MXU-padding effort is spent here.
        h = jnp.dot(pooled, w1_ref[...],
                    preferred_element_type=jnp.float32) + b1_ref[...]
        h = jnp.maximum(h, 0.0)
        att = jnp.dot(h, w2_ref[...],
                      preferred_element_type=jnp.float32) + b2_ref[...]
        # PyTorch quirk: the 'max' branch reuses the stale 'avg'
        # channel_att_raw, so the avg-branch MLP output is counted twice.
        out_ref[...] = jax.nn.sigmoid(2.0 * att).reshape(out_ref.shape)


def channel_gate(x_nchw, w1, b1, w2, b2):
    """ChannelGate forward.  x_nchw: (B, C, H, W) f32.
    Returns the attention scale broadcast to x's shape (PyTorch semantics)."""
    B, C, H, W = x_nchw.shape
    HW = H * W
    x3 = x_nchw.reshape(B, C, HW)

    # Lane-dense spatial tiling: HW_TILE is a multiple of 128, sized so a
    # double-buffered (C, HW_TILE) f32 tile stays far under the scoped VMEM
    # limit on every generation (v5e 16 MiB .. v7x 32 MiB scoped / 64 MiB phys).
    max_tile_bytes = 2 * 1024 * 1024
    hw_tile = max(128, (max_tile_bytes // (4 * C)) // 128 * 128)
    hw_tile = min(hw_tile, 2048)
    hw128 = -(-HW // 128) * 128
    hw_tile = min(hw_tile, hw128)
    n_hw = -(-HW // hw_tile)
    hw_pad = n_hw * hw_tile
    if hw_pad != HW:
        # Zero padding is exact for the SUM; we divide by the true H*W below.
        x3 = jnp.pad(x3, ((0, 0), (0, 0), (0, hw_pad - HW)))

    kernel = functools.partial(_channel_gate_kernel, inv_hw=1.0 / float(HW))

    scale = pl.pallas_call(
        kernel,
        out_shape=jax.ShapeDtypeStruct((B, 1, C), jnp.float32),
        grid=(B, n_hw),                               # reduction axis (HW) last
        in_specs=[
            pl.BlockSpec((1, C, hw_tile), lambda b, hw: (b, 0, hw)),
            # Tiny MLP params: constant index_maps -> VMEM-resident, no re-DMA.
            pl.BlockSpec(w1.shape, lambda b, hw: (0, 0)),
            pl.BlockSpec(b1.shape, lambda b, hw: (0, 0)),
            pl.BlockSpec(w2.shape, lambda b, hw: (0, 0)),
            pl.BlockSpec(b2.shape, lambda b, hw: (0, 0)),
        ],
        out_specs=pl.BlockSpec((1, 1, C), lambda b, hw: (b, 0, 0)),
        scratch_shapes=[pltpu.VMEM((1, C), jnp.float32)],
        compiler_params=pltpu.CompilerParams(
            dimension_semantics=("parallel", "arbitrary"),
            vmem_limit_bytes=32 * 1024 * 1024,
        ),
    )(x3, w1, b1, w2, b2)

    scale = scale.reshape(B, C)
    # Broadcast to NCHW outside the kernel (avoids an x-sized HBM writeback
    # inside the mem-bound kernel; a real consumer would fuse the multiply).
    return jnp.broadcast_to(scale[:, :, None, None],
                            (B, C, H, W)).astype(x_nchw.dtype)


def init_params(key, gate_channels, reduction_ratio):
    """Deterministic synthetic weights for the two Linear layers.

    PyTorch Linear is y = x @ W.T + b with W: (out, in).  We store the
    transposed weights directly:  w1: (C, C//r), w2: (C//r, C).
    """
    C = gate_channels
    Cr = gate_channels // reduction_ratio
    k1, k2, k3, k4 = jax.random.split(key, 4)
    s1 = 1.0 / np.sqrt(C)
    s2 = 1.0 / np.sqrt(Cr)
    w1 = jax.random.uniform(k1, (C, Cr), jnp.float32, -s1, s1)
    b1 = jax.random.uniform(k2, (1, Cr), jnp.float32, -s1, s1)
    w2 = jax.random.uniform(k3, (Cr, C), jnp.float32, -s2, s2)
    b2 = jax.random.uniform(k4, (1, C), jnp.float32, -s2, s2)
    return w1, b1, w2, b2


def channel_gate_ref(x, w1, b1, w2, b2):
    """Pure-JAX reference matching the PyTorch forward (incl. its quirk)."""
    B, C, H, W = x.shape
    pooled = jnp.mean(x.reshape(B, C, H * W), axis=-1)          # avg_pool2d
    att = jnp.maximum(pooled @ w1 + b1, 0.0) @ w2 + b2
    att_sum = att + att                                          # avg + stale 'max'
    scale = jax.nn.sigmoid(att_sum)
    return jnp.broadcast_to(scale[:, :, None, None], x.shape)


if __name__ == "__main__":
    # gate_channels=64, reduction_ratio=16 -> hidden=4 (keeps C//r >= 1).
    B, C, H, W = 2, 64, 16, 16
    reduction_ratio = 16

    key = jax.random.PRNGKey(0)
    kx, kp = jax.random.split(key)
    x = jax.random.normal(kx, (B, C, H, W), jnp.float32)
    w1, b1, w2, b2 = init_params(kp, C, reduction_ratio)

    out = channel_gate(x, w1, b1, w2, b2)
    out = jax.block_until_ready(out)

    ref = channel_gate_ref(x, w1, b1, w2, b2)
    assert out.shape == x.shape
    np.testing.assert_allclose(np.asarray(out), np.asarray(ref),
                               atol=1e-5, rtol=1e-5)

    print("KERNEL_OK")
</pallas_src>

<mosaic_0001>
module attributes {stable_mosaic.version = 11 : i64} {
  func.func @_channel_gate_kernel(%arg0: i32, %arg1: i32, %arg2: memref<1x64x256xf32, #tpu.memory_space<vmem>>, %arg3: memref<64x4xf32, #tpu.memory_space<vmem>>, %arg4: memref<1x4xf32, #tpu.memory_space<vmem>>, %arg5: memref<4x64xf32, #tpu.memory_space<vmem>>, %arg6: memref<1x64xf32, #tpu.memory_space<vmem>>, %arg7: memref<1x1x64xf32, #tpu.memory_space<vmem>>, %arg8: memref<1x64xf32, #tpu.memory_space<vmem>>) attributes {dimension_semantics = [#tpu.dimension_semantics<parallel>, #tpu.dimension_semantics<arbitrary>], iteration_bounds = array<i64: 2, 1>, scalar_prefetch = 0 : i64, scratch_operands = 1 : i64, tpu.core_type = #tpu.core_type<tc>, window_params = [{transform_indices = @transform_0, window_bounds = array<i64: 1, 64, 256>}, {pipeline_mode = #tpu.pipeline_mode<synchronous>, transform_indices = @transform_1, window_bounds = array<i64: 64, 4>}, {pipeline_mode = #tpu.pipeline_mode<synchronous>, transform_indices = @transform_2, window_bounds = array<i64: 1, 4>}, {pipeline_mode = #tpu.pipeline_mode<synchronous>, transform_indices = @transform_3, window_bounds = array<i64: 4, 64>}, {pipeline_mode = #tpu.pipeline_mode<synchronous>, transform_indices = @transform_4, window_bounds = array<i64: 1, 64>}, {transform_indices = @transform_5, window_bounds = array<i64: 1, 1, 64>}]} {
    %c0_i32 = arith.constant 0 : i32
    %0 = arith.cmpi eq, %arg1, %c0_i32 : i32
    %1 = arith.extui %0 : i1 to i32
    %c0_i32_0 = arith.constant 0 : i32
    %2 = arith.cmpi ne, %1, %c0_i32_0 : i32
    scf.if %2 {
      %cst_9 = arith.constant 0.000000e+00 : f32
      %11 = vector.broadcast %cst_9 : f32 to vector<1x64xf32>
      %c0_10 = arith.constant 0 : index
      %c0_11 = arith.constant 0 : index
      %12 = vector.load %arg8[%c0_10, %c0_11] : memref<1x64xf32, #tpu.memory_space<vmem>>, vector<1x64xf32>
      tpu.vector_store %arg8[%c0_10, %c0_11], %11 {strides = array<i32>} : memref<1x64xf32, #tpu.memory_space<vmem>>, vector<1x64xf32>,
    } else {
    }
    %c0 = arith.constant 0 : index
    %c0_1 = arith.constant 0 : index
    %3 = vector.load %arg8[%c0, %c0_1] : memref<1x64xf32, #tpu.memory_space<vmem>>, vector<1x64xf32>
    %c0_2 = arith.constant 0 : index
    %c0_3 = arith.constant 0 : index
    %c0_4 = arith.constant 0 : index
    %4 = vector.load %arg2[%c0_2, %c0_3, %c0_4] : memref<1x64x256xf32, #tpu.memory_space<vmem>>, vector<1x64x256xf32>
    %cst = arith.constant dense<0.000000e+00> : vector<1x64xf32>
    %5 = vector.multi_reduction <add>, %4, %cst [2] : vector<1x64x256xf32> to vector<1x64xf32>
    %6 = arith.addf %3, %5 : vector<1x64xf32>
    %c0_5 = arith.constant 0 : index
    %c0_6 = arith.constant 0 : index
    %7 = vector.load %arg8[%c0_5, %c0_6] : memref<1x64xf32, #tpu.memory_space<vmem>>, vector<1x64xf32>
    tpu.vector_store %arg8[%c0_5, %c0_6], %6 {strides = array<i32>} : memref<1x64xf32, #tpu.memory_space<vmem>>, vector<1x64xf32>,
    %c0_i32_7 = arith.constant 0 : i32
    %8 = arith.cmpi eq, %arg1, %c0_i32_7 : i32
    %9 = arith.extui %8 : i1 to i32
    %c0_i32_8 = arith.constant 0 : i32
    %10 = arith.cmpi ne, %9, %c0_i32_8 : i32
    scf.if %10 {
      %c0_9 = arith.constant 0 : index
      %c0_10 = arith.constant 0 : index
      %11 = vector.load %arg8[%c0_9, %c0_10] : memref<1x64xf32, #tpu.memory_space<vmem>>, vector<1x64xf32>
      %cst_11 = arith.constant 3.906250e-03 : f32
      %12 = vector.broadcast %cst_11 : f32 to vector<1x64xf32>
      %13 = arith.mulf %11, %12 : vector<1x64xf32>
      %c0_12 = arith.constant 0 : index
      %c0_13 = arith.constant 0 : index
      %14 = vector.load %arg3[%c0_12, %c0_13] : memref<64x4xf32, #tpu.memory_space<vmem>>, vector<64x4xf32>
      %cst_14 = arith.constant dense<0.000000e+00> : vector<1x4xf32>
      %15 = tpu.matmul %13, %14, %cst_14 {dimension_numbers = #tpu.dot_dimension_numbers<[1], [0], [0], [1], [0, 0, 1, 1], [], []>} : vector<1x64xf32>, vector<64x4xf32>, vector<1x4xf32> -> vector<1x4xf32>
      %c0_15 = arith.constant 0 : index
      %c0_16 = arith.constant 0 : index
      %16 = vector.load %arg4[%c0_15, %c0_16] : memref<1x4xf32, #tpu.memory_space<vmem>>, vector<1x4xf32>
      %17 = arith.addf %15, %16 : vector<1x4xf32>
      %cst_17 = arith.constant 0.000000e+00 : f32
      %18 = vector.broadcast %cst_17 : f32 to vector<1x4xf32>
      %19 = arith.maximumf %17, %18 : vector<1x4xf32>
      %c0_18 = arith.constant 0 : index
      %c0_19 = arith.constant 0 : index
      %20 = vector.load %arg5[%c0_18, %c0_19] : memref<4x64xf32, #tpu.memory_space<vmem>>, vector<4x64xf32>
      %cst_20 = arith.constant dense<0.000000e+00> : vector<1x64xf32>
      %21 = tpu.matmul %19, %20, %cst_20 {dimension_numbers = #tpu.dot_dimension_numbers<[1], [0], [0], [1], [0, 0, 1, 1], [], []>} : vector<1x4xf32>, vector<4x64xf32>, vector<1x64xf32> -> vector<1x64xf32>
      %c0_21 = arith.constant 0 : index
      %c0_22 = arith.constant 0 : index
      %22 = vector.load %arg6[%c0_21, %c0_22] : memref<1x64xf32, #tpu.memory_space<vmem>>, vector<1x64xf32>
      %23 = arith.addf %21, %22 : vector<1x64xf32>
      %cst_23 = arith.constant 2.000000e+00 : f32
      %24 = vector.broadcast %cst_23 : f32 to vector<1x64xf32>
      %25 = arith.mulf %24, %23 : vector<1x64xf32>
      %26 = arith.negf %25 : vector<1x64xf32>
      %27 = math.exp %26 : vector<1x64xf32>
      %cst_24 = arith.constant 1.000000e+00 : f32
      %28 = vector.broadcast %cst_24 : f32 to vector<1x64xf32>
      %29 = arith.addf %28, %27 : vector<1x64xf32>
      %30 = arith.divf %28, %29 : vector<1x64xf32>
      %31 = vector.shape_cast %30 : vector<1x64xf32> to vector<1x1x64xf32>
      %c0_25 = arith.constant 0 : index
      %c0_26 = arith.constant 0 : index
      %c0_27 = arith.constant 0 : index
      %32 = vector.load %arg7[%c0_25, %c0_26, %c0_27] : memref<1x1x64xf32, #tpu.memory_space<vmem>>, vector<1x1x64xf32>
      tpu.vector_store %arg7[%c0_25, %c0_26, %c0_27], %31 {strides = array<i32>} : memref<1x1x64xf32, #tpu.memory_space<vmem>>, vector<1x1x64xf32>,
    } else {
    }
    return
  }
  func.func @transform_0(%arg0: i32, %arg1: i32) -> (i32, i32, i32) {
    %c0_i32 = arith.constant 0 : i32
    %c0_i32_0 = arith.constant 0 : i32
    return %arg0, %c0_i32, %arg1 : i32, i32, i32
  }
  func.func @transform_1(%arg0: i32, %arg1: i32) -> (i32, i32) {
    %c0_i32 = arith.constant 0 : i32
    %c0_i32_0 = arith.constant 0 : i32
    %c0_i32_1 = arith.constant 0 : i32
    return %c0_i32, %c0_i32_0 : i32, i32
  }
  func.func @transform_2(%arg0: i32, %arg1: i32) -> (i32, i32) {
    %c0_i32 = arith.constant 0 : i32
    %c0_i32_0 = arith.constant 0 : i32
    %c0_i32_1 = arith.constant 0 : i32
    return %c0_i32, %c0_i32_0 : i32, i32
  }
  func.func @transform_3(%arg0: i32, %arg1: i32) -> (i32, i32) {
    %c0_i32 = arith.constant 0 : i32
    %c0_i32_0 = arith.constant 0 : i32
    %c0_i32_1 = arith.constant 0 : i32
    return %c0_i32, %c0_i32_0 : i32, i32
  }
  func.func @transform_4(%arg0: i32, %arg1: i32) -> (i32, i32) {
    %c0_i32 = arith.constant 0 : i32
    %c0_i32_0 = arith.constant 0 : i32
    %c0_i32_1 = arith.constant 0 : i32
    return %c0_i32, %c0_i32_0 : i32, i32
  }
  func.func @transform_5(%arg0: i32, %arg1: i32) -> (i32, i32, i32) {
    %c0_i32 = arith.constant 0 : i32
    %c0_i32_0 = arith.constant 0 : i32
    %c0_i32_1 = arith.constant 0 : i32
    return %arg0, %c0_i32, %c0_i32_0 : i32, i32, i32
  }
}

</mosaic_0001>

<bundles_post_ra>
// kernel: tpu_custom_call.1
= control target key start
LH: loop header
LB: loop body
LE: loop exit
PB: predicated region body
PF: predicated region fallthrough
CT: control target
= control target key end

     0   :  { %10 = vsyncpa [#allocation4], 0  ;;  %s1928_s0 = inlined_call_operand.hbm [shape: f32[2,64,256], index: 0, kind: input, shape index: {}]   ;;  %s1929_s1 = inlined_call_operand.vmem [shape: f32[64,4], index: 1, kind: input, shape index: {}]   ;;  %s1930_s2 = inlined_call_operand.vmem [shape: f32[1,4], index: 2, kind: input, shape index: {}]   ;;  %s1931_s3 = inlined_call_operand.vmem [shape: f32[4,64], index: 3, kind: input, shape index: {}]   ;;  %s1932_s4 = inlined_call_operand.vmem [shape: f32[1,64], index: 4, kind: input, shape index: {}]   ;;  %s1933_s5 = inlined_call_operand.hbm [shape: f32[2,1,64], index: 5, kind: output, shape index: {}]  }
   0x1   :  { %12 = vsyncpa [#allocation4 + $0x1], 0 }
   0x2   :  { %13 = vsyncpa [#allocation5], 0 }
   0x3   :  { %15 = vsyncpa [#allocation5 + $0x1], 0  ;;  %s1600_s18 = smov 0   ;;  %s1602_s19 = smov 0  }
   0x4   :  { %s1604_s20 = smov 0   ;;  %s1606_s21 = smov 0  }
   0x5   :  { %s1608_s22 = smov 0   ;;  %s1610_s23 = smov 0  }
   0x6 LB: > { %s1326_s24 = sadd.s32 4294967295, %s1560_s23   ;;  %s1327_s25 = sadd.s32 4294967294, %s1560_s23   ;;  %s1560_s23 = sphi %s1610_s23, %s21_s23   ;;  %s1556_s22 = sphi %s1608_s22, %s1944_s22   ;;  %s1552_s21 = sphi %s1606_s21, %s1943_s21   ;;  %s1548_s20 = sphi %s1604_s20, %s1942_s20   ;;  %s1544_s19 = sphi %s1602_s19, %s1941_s19   ;;  %s1540_s18 = sphi %s1600_s18, %s1940_s18  }
   0x7   : > { %s33_s26 = sadd.s32 1, %s1556_s22  ;;  %s42_s27 = sadd.s32 1, %s1548_s20 }
   0x8   : > { %p35_p0 = scmp.ge.s32.totalorder %s33_s26, 2  ;;  %p49_p1 = scmp.ne.s32.totalorder %s1548_s20, %s1544_s19 }
   0x9   : > { %p50_p2 = scmp.eq.s32.totalorder %s1560_s23, 0  ;;  %p55_p3 = scmp.ne.s32.totalorder %s1544_s19, %s1540_s18 }
   0xa   : > { %s1946_s26 = smov (%p35_p0, %s33_s26), 0  ;;  %p56_p5 = scmp.eq.s32.totalorder %s1326_s24, 0 }
   0xb   : > { %p1641_p4 = por %p50_p2, %p49_p1  ;;  %s37_s29 = ssub.s32 %s1556_s22, %s1946_s26 }
   0xc   : > { %p163_p6 = scmp.eq.s32.totalorder %s1326_s24, 1  ;;  %p40_p7 = scmp.eq.s32.totalorder %s37_s29, 0 }
   0xd   : > { %p1647_p8 = por %p56_p5, %p55_p3  ;;  %p169_p10 = scmp.eq.s32.totalorder %s1327_s25, 1 }
   0xe   : > { %p1651_p9 = por %p163_p6, %p49_p1  ;;  %p1390_p13 = scmp.lt.s32.totalorder %s1560_s23, 2 }
   0xf   : > { %s1656_s7 = scalar_select %p40_p7, %s1548_s20, %s42_s27  }
  0x10   : > { %p1658_p11 = por %p169_p10, %p55_p3  ;;  %s201_s9 = sand.u32 1, %s1548_s20  }
  0x11   : > { %s1330_s10 = sshll.u32 %s201_s9, 7  ;;  %s1342_s11 = sshll.u32 %s1556_s22, 11 }
  0x12   : > { %s213_s14 = scalar_lea.hbm %s1928_s0, %s1342_s11  ;;  %s205_s15 = scalar_lea.vmem [#allocation3], %s1330_s10 }
  0x13   : > { %s214_s16 = sshll.u32 %s205_s15, 4  ;;  %p1671_p0 = pnand %p1390_p13, %p1641_p4  ;;  %s215_s16 = int_to_ptr.vmem [resolvable:$true] %s214_s16 }
  0x14   : > { %p1333_p1 = scmp.ge.s32.totalorder %s1560_s23, 1  ;;  %s202_s24 = scalar_lea.sflag [#allocation4], %s201_s9 }
  0x15   : > { %p1454_p2 = pneg %p1671_p0  ;;  %s1465_s25 = scalar_lea.vmem %s215_s16, 2048 }
  0x16   : > { %p1466_p3 = scmp.ne.s32.totalorder %s215_s16, %s1465_s25  ;;  %s1562_s27 = smov [#allocation3]  }
  0x17   : > { %s1470_s29 = sshll.u32 %s1562_s27, 4  ;;  %s1471_s29 = int_to_ptr.vmem [resolvable:$false] %s1470_s29 }
  0x18   : > { %p1468_p5 = pnand %p1466_p3, %p1454_p2  ;;  %s1472_s10 = scalar_lea.vmem %s1471_s29, 4096 }
  0x19   : > { %p1473_p7 = scmp.lt.s32.totalorder %s215_s16, %s1471_s29  ;;  %p1474_p10 = scmp.lt.s32.totalorder %s1472_s10, %s1465_s25 }
  0x1a   : > { %p1469_p6 = pneg %p1468_p5 }
  0x1b   : > { %p1475_p12 = por %p1474_p10, %p1473_p7 }
  0x1d   : > { %p1476_p4 = pnand %p1475_p12, %p1469_p6 }
  0x1f   : > { %1479 = shalt.err (!%p1476_p4)
}
  0x20   : > { %s1563_s28 = smov 256   ;;  %s1564_s9 = smov 16  }
  0x21   : > { %1385 = dma.hbm_to_vmem [thread:$0]  (!%p1671_p0), %s213_s14, 2048, %s215_s16, %s202_s24, %s1563_s28, %s1563_s28, %s1564_s9  }
  0x22   : > { %p222_p13 = scmp.lt.s32.totalorder %s1560_s23, 3 }
  0x24   : > { %p223_p2 = pnand %p1333_p1, %p222_p13 }
  0x25   : > { %s1684_s11 = sand.u32 (!%p223_p2), 1, %s1544_s19  }
  0x26   : > { %226 = sbr.rel (%p223_p2) target bundleno = 816 (0x330), region = 40  ;;  %s1334_s12 = sshll.u32 (!%p223_p2), %s1684_s11, 7 }
  0x27   : > { %s229_s13 = scalar_lea.sflag (!%p223_p2), [#allocation4], %s1684_s11  ;;  %s232_s15 = scalar_lea.vmem (!%p223_p2), [#allocation3], %s1334_s12 }
  0x2b   : > { %1531 = dma.done.wait (%p1647_p8), %s229_s13, 2048  }
  0x2c   : > { %1533 = vsyncadd (%p1647_p8), %s229_s13, 4294965248  ;;  %v266_v0 = vld [vmem:[%s232_s15] sm:$0xff]  ;;  %v267_v1 = vld [vmem:[%s232_s15 + $0x8] sm:$0xff]  ;;  %v1565_v24 = vmov 0   ;;  %v314_v25 = vlaneseq  ;;  %v1566_v26 = vmov 1966171168  }
  0x2d   : > { %v268_v2 = vld [vmem:[%s232_s15 + $0x10] sm:$0xff]  ;;  %v282_v3 = vadd.f32 %v267_v1, %v266_v0  ;;  %v269_v4 = vld [vmem:[%s232_s15 + $0x18] sm:$0xff]  ;;  %v270_v5 = vld [vmem:[%s232_s15 + $0x20] sm:$0xff]  ;;  %1446 = vset.pattern.permute.xlu0 %v1565_v24  ;;  %1447 = vset.pattern.permute.xlu1 %v1565_v24  ;;  %v575_v27 = vunpack.c.l.s4 %v1566_v26  ;;  %vm263_vm0 = vcmask 516096   ;;  %vm1568_vm1 = vmmov 0   ;;  %s1339_s10 = sshll.u32 %s1552_s21, 4 }
  0x2e   : > { %v271_v6 = vld [vmem:[%s232_s15 + $0x28] sm:$0xff]  ;;  %v272_v8 = vld [vmem:[%s232_s15 + $0x30] sm:$0xff]  ;;  %v273_v9 = vld [vmem:[%s232_s15 + $0x38] sm:$0xff]  ;;  %v285_v10 = vadd.f32 %v269_v4, %v268_v2  ;;  %v1693_v28 = vshrl.u32 %v314_v25, 7  ;;  %vm997_vm2 = vcmask 130112   ;;  %vm1004_vm3 = vcmask 195712  }
  0x2f   : > { %v288_v7 = vadd.f32 %v271_v6, %v270_v5  ;;  %283 = vadd.xlane.f32.xlu0 %v282_v3  ;;  %v291_v11 = vadd.f32 %v273_v9, %v272_v8  ;;  %v274_v12 = vld [vmem:[%s232_s15 + $0x40] sm:$0xff]  ;;  %v275_v13 = vld [vmem:[%s232_s15 + $0x48] sm:$0xff]  ;;  %v276_v14 = vld [vmem:[%s232_s15 + $0x50] sm:$0xff]  ;;  %v576_v29 = vunpack.c.0.s8 %v575_v27  ;;  %vm1011_vm4 = vcmask 261312   ;;  %s257_s28 = scalar_lea.vmem [#allocation6], %s1684_s11  ;;  %s1237_s30 = scalar_lea.sflag [#allocation5], %s1684_s11 }
  0x30   : > { %v277_v15 = vld [vmem:[%s232_s15 + $0x58] sm:$0xff]  ;;  %v294_v16 = vadd.f32 %v275_v13, %v274_v12  ;;  %v278_v18 = vld [vmem:[%s232_s15 + $0x60] sm:$0xff]  ;;  %v279_v19 = vld [vmem:[%s232_s15 + $0x68] sm:$0xff]  ;;  %v1696_v30 = vsub.s32 0, %v1693_v28  ;;  %v1699_v31 = vsub.s32 1, %v1693_v28  ;;  %v1702_v32 = vsub.s32 2, %v1693_v28 }
  0x31   : > { %289 = vadd.xlane.f32.xlu1 %v288_v7  ;;  %v297_v17 = vadd.f32 %v277_v15, %v276_v14  ;;  %v280_v20 = vld [vmem:[%s232_s15 + $0x70] sm:$0xff]  ;;  %v281_v21 = vld [vmem:[%s232_s15 + $0x78] sm:$0xff]  ;;  %v300_v22 = vadd.f32 %v279_v19, %v278_v18  ;;  %v1705_v33 = vsub.s32 3, %v1693_v28  ;;  %v1708_v34 = vsub.s32 4, %v1693_v28  ;;  %s1249_s9 = sshll.u32 %s257_s28, 4  ;;  %s1885_s15 = scalar_lea.hbm %s1933_s5, %s1339_s10  ;;  %s1250_s9 = int_to_ptr.vmem [resolvable:$true] %s1249_s9 }
  0x32   : > { %v303_v23 = vadd.f32 %v281_v21, %v280_v20  ;;  %v1711_v35 = vsub.s32 5, %v1693_v28  ;;  %v1714_v36 = vsub.s32 6, %v1693_v28  ;;  %v1717_v37 = vsub.s32 7, %v1693_v28  ;;  %s1480_s14 = scalar_lea.vmem %s1250_s9, 16  ;;  %s1569_s16 = smov [#allocation6]  }
  0x33   : > { %286 = vadd.xlane.f32.xlu0 %v285_v10  ;;  %v1720_v39 = vsub.s32 %v576_v29, %v1693_v28  ;;  %vm1018_vm5 = vcmask 326912   ;;  %vm1025_vm6 = vcmask 392512   ;;  %vm1032_vm7 = vcmask 458112   ;;  %p1481_p8 = scmp.ne.s32.totalorder %s1250_s9, %s1480_s14  ;;  %s1484_s17 = sshll.u32 %s1569_s16, 4  ;;  %s1485_s17 = int_to_ptr.vmem [resolvable:$false] %s1484_s17 }
  0x34   : > { %vm1039_vm8 = vcmask 523712   ;;  %vm1073_vm9 = vcmask 523264   ;;  %vm1154_vm10 = vcmask 1043456   ;;  %vm1150_vm11 = vcmask 31744   ;;  %s1486_s21 = scalar_lea.vmem %s1485_s17, 32  ;;  %p1487_p1 = scmp.lt.s32.totalorder %s1250_s9, %s1485_s17 }
  0x35   : > { %292 = vadd.xlane.f32.xlu1 %v291_v11  ;;  %p1482_p12 = pnand %p1481_p8, %p1651_p9  ;;  %p1488_p3 = scmp.lt.s32.totalorder %s1486_s21, %s1480_s14 }
  0x37   : > { %295 = vadd.xlane.f32.xlu0 %v294_v16  ;;  %p1483_p0 = pneg %p1482_p12  ;;  %p1489_p5 = por %p1488_p3, %p1487_p1 }
  0x39   : > { %298 = vadd.xlane.f32.xlu1 %v297_v17  ;;  %p1490_p6 = pnand %p1489_p5, %p1483_p0 }
  0x3b   : > { %301 = vadd.xlane.f32.xlu0 %v300_v22 }
  0x3d   : > { %304 = vadd.xlane.f32.xlu1 %v303_v23 }
  0xb8   : > { %v284_v38 = vpop.xlane.xlu0 %283 }
  0xb9   : > { %v317_v41 = vrot.slane %v284_v38, %v1696_v30  ;;  %v321_v42 = vrot.slane %v284_v38, %v1699_v31  ;;  %v325_v43 = vrot.slane %v284_v38, %v1702_v32  ;;  %v329_v44 = vrot.slane %v284_v38, %v1705_v33 }
  0xba   : > { %v290_v40 = vpop.xlane.xlu1 %289  ;;  %v333_v45 = vrot.slane %v284_v38, %v1708_v34  ;;  %v337_v46 = vrot.slane %v284_v38, %v1711_v35  ;;  %v341_v47 = vrot.slane %v284_v38, %v1714_v36  ;;  %v345_v48 = vrot.slane %v284_v38, %v1717_v37 }
  0xbb   : > { %v570_v49 = vcombine.low %v317_v41, %v321_v42  ;;  %v571_v50 = vcombine.low %v325_v43, %v329_v44  ;;  %v381_v51 = vrot.slane %v290_v40, %v1696_v30  ;;  %v385_v52 = vrot.slane %v290_v40, %v1699_v31 }
  0xbc   : > { %v287_v53 = vpop.xlane.xlu0 %286  ;;  %v572_v54 = vcombine.low %v333_v45, %v337_v46  ;;  %v573_v55 = vcombine.low %v341_v47, %v345_v48  ;;  %v389_v56 = vrot.slane %v290_v40, %v1702_v32  ;;  %v393_v57 = vrot.slane %v290_v40, %v1705_v33 }
  0xbd   : > { %v580_v58 = vrot.slane %v570_v49, %v1720_v39  ;;  %v587_v59 = vrot.slane %v571_v50, %v1720_v39  ;;  %v349_v60 = vrot.slane %v287_v53, %v1696_v30  ;;  %v353_v61 = vrot.slane %v287_v53, %v1699_v31 }
  0xbe   : > { %v594_v62 = vrot.slane %v572_v54, %v1720_v39  ;;  %v601_v63 = vrot.slane %v573_v55, %v1720_v39  ;;  %v357_v0 = vrot.slane %v287_v53, %v1702_v32  ;;  %v361_v1 = vrot.slane %v287_v53, %v1705_v33  ;;  %v293_v14 = vpop.xlane.xlu1 %292 }
  0xbf   : > { %v602_v2 = vcombine.low %v580_v58, %v587_v59  ;;  %v365_v3 = vrot.slane %v287_v53, %v1708_v34  ;;  %v369_v4 = vrot.slane %v287_v53, %v1711_v35  ;;  %v373_v5 = vrot.slane %v287_v53, %v1714_v36 }
  0xc0   : > { %v603_v6 = vcombine.low %v594_v62, %v601_v63  ;;  %v377_v7 = vrot.slane %v287_v53, %v1717_v37  ;;  %v619_v8 = vcombine.low %v349_v60, %v353_v61  ;;  %v620_v9 = vcombine.low %v357_v0, %v361_v1  ;;  %v296_v50 = vpop.xlane.xlu0 %295 }
  0xc1   : > { %v610_v10 = vrot.slane %v602_v2, %v1720_v39  ;;  %v621_v11 = vcombine.low %v365_v3, %v369_v4  ;;  %v397_v12 = vrot.slane %v290_v40, %v1708_v34  ;;  %v401_v13 = vrot.slane %v290_v40, %v1711_v35 }
  0xc2   : > { %v617_v15 = vrot.slane %v603_v6, %v1720_v39  ;;  %v622_v16 = vcombine.low %v373_v5, %v377_v7  ;;  %v629_v17 = vrot.slane %v619_v8, %v1720_v39  ;;  %v636_v18 = vrot.slane %v620_v9, %v1720_v39  ;;  %v299_v3 = vpop.xlane.xlu1 %298 }
  0xc3   : > { %v643_v19 = vrot.slane %v621_v11, %v1720_v39  ;;  %v405_v20 = vrot.slane %v290_v40, %v1714_v36  ;;  %v409_v21 = vrot.slane %v290_v40, %v1717_v37  ;;  %v668_v22 = vcombine.low %v381_v51, %v385_v52 }
  0xc4   : > { %v618_v23 = vcombine.low %v610_v10, %v617_v15  ;;  %v650_v24 = vrot.slane %v622_v16, %v1720_v39  ;;  %v651_v26 = vcombine.low %v629_v17, %v636_v18  ;;  %v669_v27 = vcombine.low %v389_v56, %v393_v57 }
  0xc5   : > { %v670_v29 = vcombine.low %v397_v12, %v401_v13  ;;  %v671_v38 = vcombine.low %v405_v20, %v409_v21  ;;  %v678_v41 = vrot.slane %v668_v22, %v1720_v39  ;;  %v413_v42 = vrot.slane %v293_v14, %v1696_v30 }
  0xc6   : > { %963 = vperm.xlu0 %1446, %v618_v23   ;;  %v652_v43 = vcombine.low %v643_v19, %v650_v24  ;;  %v659_v44 = vrot.slane %v651_v26, %v1720_v39  ;;  %v685_v45 = vrot.slane %v669_v27, %v1720_v39  ;;  %v417_v40 = vrot.slane %v293_v14, %v1699_v31 }
  0xc7   : > { %v692_v46 = vrot.slane %v670_v29, %v1720_v39  ;;  %v699_v47 = vrot.slane %v671_v38, %v1720_v39  ;;  %v421_v48 = vrot.slane %v293_v14, %v1702_v32  ;;  %v425_v49 = vrot.slane %v293_v14, %v1705_v33  ;;  %v302_v38 = vpop.xlane.xlu0 %301 }
  0xc8   : > { %v666_v51 = vrot.slane %v652_v43, %v1720_v39  ;;  %v700_v52 = vcombine.low %v678_v41, %v685_v45  ;;  %v429_v53 = vrot.slane %v293_v14, %v1708_v34  ;;  %v433_v54 = vrot.slane %v293_v14, %v1711_v35 }
  0xc9   : > { %v701_v55 = vcombine.low %v692_v46, %v699_v47  ;;  %v437_v56 = vrot.slane %v293_v14, %v1714_v36  ;;  %v441_v57 = vrot.slane %v293_v14, %v1717_v37  ;;  %v717_v58 = vcombine.low %v413_v42, %v417_v40 }
  0xca   : > { %v667_v59 = vcombine.low %v659_v44, %v666_v51  ;;  %v708_v60 = vrot.slane %v700_v52, %v1720_v39  ;;  %v718_v61 = vcombine.low %v421_v48, %v425_v49  ;;  %v719_v62 = vcombine.low %v429_v53, %v433_v54 }
  0xcb   : > { %v715_v63 = vrot.slane %v701_v55, %v1720_v39  ;;  %v720_v0 = vcombine.low %v437_v56, %v441_v57  ;;  %v727_v1 = vrot.slane %v717_v58, %v1720_v39  ;;  %v445_v2 = vrot.slane %v296_v50, %v1696_v30 }
  0xcc   : > { %966 = vperm.xlu1 %1447, %v667_v59   ;;  %v734_v4 = vrot.slane %v718_v61, %v1720_v39  ;;  %v741_v5 = vrot.slane %v719_v62, %v1720_v39  ;;  %v449_v6 = vrot.slane %v296_v50, %v1699_v31  ;;  %v453_v7 = vrot.slane %v296_v50, %v1702_v32 }
  0xcd   : > { %v716_v8 = vcombine.low %v708_v60, %v715_v63  ;;  %v748_v9 = vrot.slane %v720_v0, %v1720_v39  ;;  %v457_v10 = vrot.slane %v296_v50, %v1705_v33  ;;  %v461_v11 = vrot.slane %v296_v50, %v1708_v34  ;;  %v305_v60 = vpop.xlane.xlu1 %304 }
  0xce   : > { %v749_v12 = vcombine.low %v727_v1, %v734_v4  ;;  %v465_v13 = vrot.slane %v296_v50, %v1711_v35  ;;  %v469_v14 = vrot.slane %v296_v50, %v1714_v36  ;;  %v473_v15 = vrot.slane %v296_v50, %v1717_v37 }
  0xcf   : > { %v750_v16 = vcombine.low %v741_v5, %v748_v9  ;;  %v766_v17 = vcombine.low %v445_v2, %v449_v6  ;;  %v767_v18 = vcombine.low %v453_v7, %v457_v10  ;;  %v477_v19 = vrot.slane %v299_v3, %v1696_v30 }
  0xd0   : > { %969 = vperm.xlu1 %1447, %v716_v8   ;;  %v757_v20 = vrot.slane %v749_v12, %v1720_v39  ;;  %v768_v21 = vcombine.low %v461_v11, %v465_v13  ;;  %v769_v22 = vcombine.low %v469_v14, %v473_v15  ;;  %v481_v23 = vrot.slane %v299_v3, %v1699_v31 }
  0xd1   : > { %v764_v24 = vrot.slane %v750_v16, %v1720_v39  ;;  %v776_v26 = vrot.slane %v766_v17, %v1720_v39  ;;  %v783_v27 = vrot.slane %v767_v18, %v1720_v39  ;;  %v485_v29 = vrot.slane %v299_v3, %v1702_v32 }
  0xd2   : > { %v790_v41 = vrot.slane %v768_v21, %v1720_v39  ;;  %v797_v42 = vrot.slane %v769_v22, %v1720_v39  ;;  %v489_v43 = vrot.slane %v299_v3, %v1705_v33  ;;  %v493_v44 = vrot.slane %v299_v3, %v1708_v34 }
  0xd3   : > { %v765_v45 = vcombine.low %v757_v20, %v764_v24  ;;  %v798_v40 = vcombine.low %v776_v26, %v783_v27  ;;  %v497_v46 = vrot.slane %v299_v3, %v1711_v35  ;;  %v501_v47 = vrot.slane %v299_v3, %v1714_v36 }
  0xd4   : > { %v799_v48 = vcombine.low %v790_v41, %v797_v42  ;;  %v505_v49 = vrot.slane %v299_v3, %v1717_v37  ;;  %v815_v50 = vcombine.low %v477_v19, %v481_v23  ;;  %v816_v51 = vcombine.low %v485_v29, %v489_v43 }
  0xd5   : > { %972 = vperm.xlu1 %1447, %v765_v45   ;;  %v806_v52 = vrot.slane %v798_v40, %v1720_v39  ;;  %v817_v53 = vcombine.low %v493_v44, %v497_v46  ;;  %v509_v54 = vrot.slane %v302_v38, %v1696_v30  ;;  %v513_v55 = vrot.slane %v302_v38, %v1699_v31 }
  0xd6   : > { %v813_v56 = vrot.slane %v799_v48, %v1720_v39  ;;  %v818_v57 = vcombine.low %v501_v47, %v505_v49  ;;  %v825_v58 = vrot.slane %v815_v50, %v1720_v39  ;;  %v832_v59 = vrot.slane %v816_v51, %v1720_v39  ;;  %v1071_v49 = vld [vmem:[%s1929_s1 + $0x38] sm:$0xff]  ;;  %v1070_v50 = vld [vmem:[%s1929_s1 + $0x30] sm:$0xff]  ;;  %v1069_v51 = vld [vmem:[%s1929_s1 + $0x28] sm:$0xff] }
  0xd7   : > { %v839_v61 = vrot.slane %v817_v53, %v1720_v39  ;;  %v517_v62 = vrot.slane %v302_v38, %v1702_v32  ;;  %v521_v63 = vrot.slane %v302_v38, %v1705_v33  ;;  %v525_v0 = vrot.slane %v302_v38, %v1708_v34  ;;  %v1067_v53 = vld [vmem:[%s1929_s1 + $0x18] sm:$0xff] }
  0xd8   : > { %v814_v1 = vcombine.low %v806_v52, %v813_v56  ;;  %v846_v2 = vrot.slane %v818_v57, %v1720_v39  ;;  %v847_v3 = vcombine.low %v825_v58, %v832_v59  ;;  %v529_v4 = vrot.slane %v302_v38, %v1711_v35  ;;  %v1068_v52 = vld [vmem:[%s1929_s1 + $0x20] sm:$0xff] }
  0xd9   : > { %v533_v5 = vrot.slane %v302_v38, %v1714_v36  ;;  %v537_v6 = vrot.slane %v302_v38, %v1717_v37  ;;  %v864_v7 = vcombine.low %v509_v54, %v513_v55  ;;  %v865_v8 = vcombine.low %v517_v62, %v521_v63  ;;  %v1066_v54 = vld [vmem:[%s1929_s1 + $0x10] sm:$0xff]  ;;  %v1065_v55 = vld [vmem:[%s1929_s1 + $0x8] sm:$0xff]  ;;  %v1064_v56 = vld [vmem:[%s1929_s1] sm:$0xff] }
  0xda   : > { %975 = vperm.xlu1 %1447, %v814_v1   ;;  %v848_v9 = vcombine.low %v839_v61, %v846_v2  ;;  %v855_v10 = vrot.slane %v847_v3, %v1720_v39  ;;  %v866_v11 = vcombine.low %v525_v0, %v529_v4  ;;  %v541_v12 = vrot.slane %v305_v60, %v1696_v30 }
  0xdb   : > { %v867_v13 = vcombine.low %v533_v5, %v537_v6  ;;  %v874_v14 = vrot.slane %v864_v7, %v1720_v39  ;;  %v881_v15 = vrot.slane %v865_v8, %v1720_v39  ;;  %v545_v16 = vrot.slane %v305_v60, %v1699_v31 }
  0xdc   : > { %v862_v17 = vrot.slane %v848_v9, %v1720_v39  ;;  %v888_v18 = vrot.slane %v866_v11, %v1720_v39  ;;  %v549_v19 = vrot.slane %v305_v60, %v1702_v32  ;;  %v553_v20 = vrot.slane %v305_v60, %v1705_v33 }
  0xdd   : > { %v895_v21 = vrot.slane %v867_v13, %v1720_v39  ;;  %v896_v22 = vcombine.low %v874_v14, %v881_v15  ;;  %v557_v30 = vrot.slane %v305_v60, %v1708_v34  ;;  %v561_v23 = vrot.slane %v305_v60, %v1711_v35 }
  0xde   : > { %v863_v24 = vcombine.low %v855_v10, %v862_v17  ;;  %v565_v26 = vrot.slane %v305_v60, %v1714_v36  ;;  %v569_v31 = vrot.slane %v305_v60, %v1717_v37  ;;  %v913_v27 = vcombine.low %v541_v12, %v545_v16 }
  0xdf   : > { %v897_v29 = vcombine.low %v888_v18, %v895_v21  ;;  %v904_v38 = vrot.slane %v896_v22, %v1720_v39  ;;  %v914_v41 = vcombine.low %v549_v19, %v553_v20  ;;  %v915_v32 = vcombine.low %v557_v30, %v561_v23 }
  0xe0   : > { %978 = vperm.xlu1 %1447, %v863_v24   ;;  %v916_v33 = vcombine.low %v565_v26, %v569_v31  ;;  %v923_v42 = vrot.slane %v913_v27, %v1720_v39  ;;  %v1567_v48 = vmov 0.0   ;;  %v987_v60 = vand.u32 127, %v314_v25 }
  0xe1   : > { %v911_v43 = vrot.slane %v897_v29, %v1720_v39  ;;  %v930_v34 = vrot.slane %v914_v41, %v1720_v39  ;;  %v937_v35 = vrot.slane %v915_v32, %v1720_v39  ;;  %264 = vst.msk [vmem:[#allocation2] sm:$0x1] %vm263_vm0, %v1567_v48  ;;  %1354 = vmatprep.subr.mxu0 %v1567_v48 }
  0xe2   : > { %v944_v36 = vrot.slane %v916_v33, %v1720_v39  ;;  %1373 = vmatprep.subr.mxu1 %v1567_v48  ;;  %1355 = vmatpush3.msra.mxu0 %v1071_v49  ;;  %v992_v62 = vadd.s32 4294967288, %v987_v60  ;;  %v999_v63 = vadd.s32 4294967280, %v987_v60  ;;  %v1006_v0 = vadd.s32 4294967272, %v987_v60 }
  0xe3   : > { %v912_v44 = vcombine.low %v904_v38, %v911_v43  ;;  %v945_v37 = vcombine.low %v923_v42, %v930_v34  ;;  %1356 = vmatprep.subr.mxu0 %v1567_v48  ;;  %1370 = vmatprep.mubr.msk.f32.mxu0 %vm1568_vm1, %v1567_v48  ;;  %v1013_v1 = vadd.s32 4294967264, %v987_v60  ;;  %v1020_v3 = vadd.s32 4294967256, %v987_v60  ;;  %v1148_v34 = vld [vmem:[%s1931_s3] sm:$0xf] }
  0xe4   : > { %v946_v45 = vcombine.low %v937_v35, %v944_v36  ;;  %1357 = vmatpush3.msra.mxu0 %v1070_v50  ;;  %1375 = vmatprep.mubr.msk.f32.mxu1 %vm1568_vm1, %v1567_v48  ;;  %v995_v2 = vsub.s32 %v992_v62, %v1693_v28  ;;  %v1002_v4 = vsub.s32 %v999_v63, %v1693_v28  ;;  %v1027_v6 = vadd.s32 4294967248, %v987_v60  ;;  %v1072_v35 = vld [vmem:[%s1930_s2] sm:$0x1] }
  0xe5   : > { %981 = vperm.xlu1 %1447, %v912_v44   ;;  %v953_v40 = vrot.slane %v945_v37, %v1720_v39  ;;  %1358 = vmatprep.subr.mxu0 %v1567_v48  ;;  %v990_v7 = vsub.s32 %v987_v60, %v1693_v28  ;;  %v1009_v8 = vsub.s32 %v1006_v0, %v1693_v28  ;;  %v1034_v12 = vadd.s32 4294967240, %v987_v60 }
  0xe6   : > { %v960_v46 = vrot.slane %v946_v45, %v1720_v39  ;;  %1359 = vmatpush3.msra.mxu0 %v1069_v51  ;;  %v1016_v10 = vsub.s32 %v1013_v1, %v1693_v28  ;;  %v1023_v11 = vsub.s32 %v1020_v3, %v1693_v28  ;;  %v1030_v14 = vsub.s32 %v1027_v6, %v1693_v28  ;;  %v1149_v45 = vld [vmem:[%s1932_s4] sm:$0x1] }
  0xe7   : > { %1360 = vmatprep.subr.mxu0 %v1567_v48  ;;  %v1037_v21 = vsub.s32 %v1034_v12, %v1693_v28  ;;  %1374 = vmatpush3.msk.msra.mxu1 %vm1154_vm10, %v1148_v34 }
  0xe8   : > { %v961_v47 = vcombine.low %v953_v40, %v960_v46  ;;  %1361 = vmatpush3.msra.mxu0 %v1068_v52  ;;  %v265_v32 = vld [vmem:[#allocation2] sm:$0x1] }
  0xe9   : > { %1362 = vmatprep.subr.mxu0 %v1567_v48 }
  0xea   : > { %984 = vperm.xlu1 %1447, %v961_v47   ;;  %1363 = vmatpush3.msra.mxu0 %v1067_v53 }
  0xeb   : > { %1364 = vmatprep.subr.mxu0 %v1567_v48 }
  0xec   : > { %1365 = vmatpush3.msra.mxu0 %v1066_v54 }
  0xed   : > { %1366 = vmatprep.subr.mxu0 %v1567_v48 }
  0xee   : > { %1367 = vmatpush3.msra.mxu0 %v1065_v55 }
  0xef   : > { %1368 = vmatprep.subr.mxu0 %v1567_v48 }
  0xf0   : > { %1369 = vmatpush3.msra.mxu0 %v1064_v56 }
 0x141   : > { %v964_v9 = vpop.permute.xlu0 %963 }
 0x142   : > { %v991_v15 = vrot.slane %v964_v9, %v990_v7 }
 0x147   : > { %v967_v57 = vpop.permute.xlu1 %966 }
 0x148   : > { %v996_v25 = vrot.slane %v967_v57, %v995_v2 }
 0x14a   : > { %v998_v19 = vsel %vm997_vm2, %v996_v25, %v991_v15 }
 0x14b   : > { %v970_v58 = vpop.permute.xlu1 %969 }
 0x14c   : > { %v1003_v13 = vrot.slane %v970_v58, %v1002_v4 }
 0x14e   : > { %v1005_v22 = vsel %vm1004_vm3, %v1003_v13, %v998_v19 }
 0x150   : > { %v973_v59 = vpop.permute.xlu1 %972 }
 0x151   : > { %v1010_v16 = vrot.slane %v973_v59, %v1009_v8 }
 0x153   : > { %v1012_v23 = vsel %vm1011_vm4, %v1010_v16, %v1005_v22 }
 0x155   : > { %v976_v61 = vpop.permute.xlu1 %975 }
 0x156   : > { %v1017_v18 = vrot.slane %v976_v61, %v1016_v10 }
 0x158   : > { %v1019_v24 = vsel %vm1018_vm5, %v1017_v18, %v1012_v23 }
 0x15b   : > { %v979_v5 = vpop.permute.xlu1 %978 }
 0x15c   : > { %v1024_v20 = vrot.slane %v979_v5, %v1023_v11 }
 0x15e   : > { %v1026_v31 = vsel %vm1025_vm6, %v1024_v20, %v1019_v24 }
 0x160   : > { %v982_v17 = vpop.permute.xlu1 %981 }
 0x161   : > { %v1031_v30 = vrot.slane %v982_v17, %v1030_v14 }
 0x163   : > { %v1033_v29 = vsel %vm1032_vm7, %v1031_v30, %v1026_v31 }
 0x165   : > { %v985_v26 = vpop.permute.xlu1 %984 }
 0x166   : > { %v1038_v27 = vrot.slane %v985_v26, %v1037_v21 }
 0x168   : > { %v1040_v38 = vsel %vm1039_vm8, %v1038_v27, %v1033_v29 }
 0x169   : > { %v1047_v41 = vrot.slane %v1040_v38, %v1720_v39 }
 0x16b   : > { %v1054_v33 = vrot.slane %v1047_v41, %v1720_v39 }
 0x16d   : > { %v1056_v42 = vadd.f32 %v1054_v33, %v265_v32 }
 0x16f   : > { %1058 = vst.msk [vmem:[#allocation2] sm:$0x1] %vm263_vm0, %v1056_v42 }
 0x176   : > { %v1062_v28 = vld [vmem:[#allocation2] sm:$0x1] }
 0x177   : > { %v1063_v43 = vmul.f32 0.00390625, %v1062_v28 }
 0x179   : > { %1371 = vmatmul.mubr.msk.f32.vlgmr.msra.gmra.mxu0 %vm1073_vm9, %v1063_v43 }
 0x239   : > { %v1143_v36 = vpop.f32.mrf.mxu0 }
 0x23a   : > { %v1144_v39 = vadd.f32 %v1143_v36, %v1072_v35 }
 0x23b   : > { %v1372_v44 = vpop.f32.mrf.mxu0 }
 0x23c   : > { %v1147_v37 = vmax.f32 %v1144_v39, 0.0 }
 0x23e   : > { %1376 = vmatmul.mubr.msk.f32.vlgmr.msra.gmra.mxu1 %vm1150_vm11, %v1147_v37 }
 0x2fe   : > { %v1224_v40 = vpop.f32.mrf.mxu1 }
 0x2ff   : > { %v1225_v46 = vadd.f32 %v1224_v40, %v1149_v45 }
 0x300   : > { %v1377_v47 = vpop.f32.mrf.mxu1 }
 0x301   : > { %v1338_v48 = vmul.f32 -2.0, %v1225_v46 }
 0x303   : > { %v1230_v49 = vmul.f32 1.442695, %v1338_v48 }
 0x305   : > { %1448 = vpow2.f32 %v1230_v49 }
 0x312   : > { %v1449_v50 = vpop.eup %1448 }
 0x313   : > { %v1232_v51 = vadd.f32 1.0, %v1449_v50 }
 0x315   : > { %1450 = vrcp.f32 %v1232_v51 }
 0x322   : > { %v1451_v52 = vpop.eup %1450 }
 0x323   : > { %1235 = vst.msk [vmem:[%s257_s28] sm:$0x1] %vm263_vm0, %v1451_v52 }
 0x324   : > { %1493 = shalt.err (!%p1490_p6)
}
 0x325   : > { %s1494_s24 = scalar_lea.hbm %s1885_s15, 16  ;;  %s1498_s27 = scalar_lea.hbm %s1933_s5, 32 }
 0x326   : > { %p1495_p7 = scmp.ne.s32.totalorder %s1885_s15, %s1494_s24  ;;  %p1499_p13 = scmp.lt.s32.totalorder %s1885_s15, %s1933_s5 }
 0x327   : > { %p1500_p2 = scmp.lt.s32.totalorder %s1498_s27, %s1494_s24 }
 0x328   : > { %p1496_p10 = pnand %p1495_p7, %p1651_p9 }
 0x329   : > { %p1501_p8 = por %p1500_p2, %p1499_p13 }
 0x32a   : > { %p1497_p4 = pneg %p1496_p10 }
 0x32c   : > { %p1502_p12 = pnand %p1501_p8, %p1497_p4 }
 0x32e   : > { %1505 = shalt.err (!%p1502_p12)
}
 0x32f   : > { %1380 = dma.vmem_to_hbm [thread:$0]  (%p1651_p9), %s1250_s9, 16, %s1885_s15, %s1237_s30  }
 0x330 PF: > { %s1261_s28 = sand.u32 1, %s1540_s18   ;;  %p1939_p0 = scmp.ge.s32.totalorder %s1560_s23, 2 }
 0x331   : > { %s1262_s12 = scalar_lea.sflag [#allocation5], %s1261_s28 }
 0x332   : > { %p1387_p1 = pnand %p1939_p0, %p1658_p11 }
 0x334   : > { %p1388_p3 = pneg %p1387_p1 }
 0x336   : > { %1535 = dma.done.wait (%p1388_p3), %s1262_s12, 16  }
 0x337   : > { %1537 = vsyncadd (%p1388_p3), %s1262_s12, 4294967280  ;;  %s21_s23 = sadd.s32 1, %s1560_s23   ;;  %s1940_s18 = smov %s1544_s19 }
 0x338   : > { %p18_p5 = scmp.ge.s32.totalorder %s21_s23, 4   ;;  %s1941_s19 = smov %s1548_s20 }
 0x339   : > { %s1942_s20 = smov %s1656_s7  ;;  %s1943_s21 = smov %s1556_s22 }
 0x33a   : > { %s1944_s22 = smov %s1946_s26  ;;  %20 = sbr.rel (!%p18_p5) target bundleno = 6 (0x6), region = 93 }
 0x33f   :  { %1266 = vsyncpa [#allocation4], 1 }
 0x340   :  { %1268 = vsyncpa [#allocation4 + $0x1], 1 }
 0x341   :  { %1269 = vsyncpa [#allocation5], 1 }
 0x342   :  { %1271 = vsyncpa [#allocation5 + $0x1], 1 }

</bundles_post_ra>
